<compile_context>
chip_gen: v7x
topology: tpu7x:2x2x1
jax: 0.10.0
libtpu: 0.0.40
codegen_flags: <defaults>
</compile_context>

<pallas_src>
import jax
import jax.numpy as jnp
from jax.experimental import pallas as pl
from jax.experimental.pallas import tpu as pltpu


_LANES = 128
# Explicit scoped-VMEM limit: 4 MiB blocks double-buffered for in+out = 16 MiB,
# leave headroom.  32 MiB is safe on every generation (v7x physical = 64 MiB).
_VMEM_LIMIT_BYTES = 32 << 20


def _copy_kernel(x_ref, o_ref):
    # Pure identity copy of one lane-dense (block_rows, 128) tile.
    o_ref[...] = x_ref[...]


def _device_kind() -> str:
    try:
        return jax.devices()[0].device_kind.lower()
    except Exception:
        return ""


def _block_cap_bytes() -> int:
    kind = _device_kind()
    if "v5" in kind:
        # v5e: 16 MiB scoped-VMEM default and ~0.8 TB/s HBM -- 1-2 MiB blocks
        # already saturate bandwidth, so don't pay the VMEM risk for nothing.
        return 2 << 20
    # v6e / v7x: 4 MiB blocks amortize the ~0.35us fixed per-step overhead;
    # double-buffered in+out = 16 MiB, under our explicit 32 MiB vmem limit.
    return 4 << 20


def _sublane_quantum(dtype) -> int:
    """Native packed-tile height: 8 rows for 4-byte dtypes, 16 for 2-byte,
    32 for 1-byte -- keeps loads/stores full-width and unmasked."""
    itemsize = jnp.dtype(dtype).itemsize
    return max(8, 32 // max(itemsize, 1))


def _pick_block_rows(rows: int, dtype) -> int:
    """Fixed (generation- and dtype-aware) block height; no divisor search."""
    q = _sublane_quantum(dtype)
    itemsize = jnp.dtype(dtype).itemsize
    cap_rows = max(q, (_block_cap_bytes() // (_LANES * itemsize)) // q * q)
    rows_q = pl.cdiv(rows, q) * q
    return min(cap_rows, rows_q)


def pallas_identity(x, *, donate: bool = False):
    """Lane-dense, tiled Pallas identity copy.  Debug/self-test path only --
    NOT called from perceptor_forward (which has no computation to do).

    Set donate=True (and donate the buffer in the caller) to alias the output
    onto the input slab via input_output_aliases={0: 0}."""
    n = x.size
    if n == 0:
        return x
    dtype = x.dtype
    itemsize = jnp.dtype(dtype).itemsize

    rows = pl.cdiv(n, _LANES)
    block_rows = _pick_block_rows(rows, dtype)
    padded_rows = pl.cdiv(rows, block_rows) * block_rows
    grid_steps = padded_rows // block_rows

    # Pad the flattened slab to a whole number of equal blocks (handles sizes
    # that are not multiples of the native tile without masked edge blocks).
    flat = x.reshape(-1)
    pad = padded_rows * _LANES - n
    if pad:
        flat = jnp.pad(flat, (0, pad))
    x2d = flat.reshape(padded_rows, _LANES)   # lane-dense: last dim = 128

    # Megacore: on v7x's 2 TensorCores, CORE_PARALLEL lets both cores issue
    # DMAs on disjoint halves of the independent grid (copy stays HBM-bound,
    # so a modest win).  Elsewhere PARALLEL is the measured-neutral default.
    semantics = pltpu.PARALLEL
    if "v7" in _device_kind() and grid_steps >= 2 and grid_steps % 2 == 0:
        semantics = pltpu.CORE_PARALLEL

    slab_bytes = padded_rows * _LANES * itemsize
    out2d = pl.pallas_call(
        _copy_kernel,
        out_shape=jax.ShapeDtypeStruct((padded_rows, _LANES), dtype),
        grid=(grid_steps,),
        in_specs=[pl.BlockSpec((block_rows, _LANES), lambda i: (i, 0))],
        out_specs=pl.BlockSpec((block_rows, _LANES), lambda i: (i, 0)),
        compiler_params=pltpu.CompilerParams(
            dimension_semantics=(semantics,),
            vmem_limit_bytes=_VMEM_LIMIT_BYTES,
        ),
        cost_estimate=pl.CostEstimate(
            flops=0, transcendentals=0, bytes_accessed=2 * slab_bytes
        ),
        input_output_aliases=({0: 0} if donate else {}),
    )(x2d)

    out_flat = out2d.reshape(-1)
    if pad:
        out_flat = out_flat[:n]
    return out_flat.reshape(x.shape)


def perceptor_forward(images, domains, contents):
    """JAX equivalent of Perceptor.forward.

    images:   (batch, channels, height, width)
    domains:  (batch, num_domains)
    contents: (batch, num_contents)

    The reference forward body is `pass`: no computation, returns None.
    No Pallas work is issued on this hot path -- it would be pure dead work.
    """
    del images, domains, contents
    return None


if __name__ == "__main__":
    key = jax.random.PRNGKey(0)
    k_img, k_dom, k_con = jax.random.split(key, 3)

    batch, channels, height, width = 2, 4, 16, 16
    num_domains, num_contents = 4, 8

    images = jax.random.normal(
        k_img, (batch, channels, height, width), jnp.float32
    )
    domains = jax.random.normal(k_dom, (batch, num_domains), jnp.float32)
    contents = jax.random.normal(k_con, (batch, num_contents), jnp.float32)

    # --- Debug/self-test path (never called by perceptor_forward) ----------
    # f32, size divisible by 8*128: lane-dense slab, unmasked full tiles.
    img_copy = pallas_identity(images)
    jax.block_until_ready(img_copy)
    assert jnp.array_equal(img_copy, images)

    # bf16 with an awkward element count (not a multiple of 8*128): exercises
    # the padding path and the dtype-aware 16-row sublane quantum.
    ragged = jax.random.normal(k_con, (3, 5, 7, 11), jnp.float32).astype(
        jnp.bfloat16
    )
    ragged_copy = pallas_identity(ragged)
    jax.block_until_ready(ragged_copy)
    assert jnp.array_equal(ragged_copy, ragged)

    # Aliased/donated variant under jit: output aliases the input slab, the
    # donated operand is a throwaway copy so `images` stays valid to compare.
    scratch = images + 0.0
    donated = jax.jit(
        lambda a: pallas_identity(a, donate=True), donate_argnums=0
    )(scratch)
    jax.block_until_ready(donated)
    assert jnp.array_equal(donated, images)

    # --- Module-faithful forward: the PyTorch stub returns None and the
    # wrapper issues no device work.
    result = perceptor_forward(images, domains, contents)
    assert result is None

    print("KERNEL_OK")
</pallas_src>

<mosaic_0001>
module attributes {stable_mosaic.version = 11 : i64} {
  func.func @_copy_kernel(%arg0: i32, %arg1: memref<16x128xf32, #tpu.memory_space<vmem>>, %arg2: memref<16x128xf32, #tpu.memory_space<vmem>>) attributes {dimension_semantics = [#tpu.dimension_semantics<parallel>], iteration_bounds = array<i64: 1>, scalar_prefetch = 0 : i64, scratch_operands = 0 : i64, tpu.core_type = #tpu.core_type<tc>, window_params = [{transform_indices = @transform_0, window_bounds = array<i64: 16, 128>}, {transform_indices = @transform_1, window_bounds = array<i64: 16, 128>}]} {
    %c0 = arith.constant 0 : index
    %c0_0 = arith.constant 0 : index
    %0 = vector.load %arg1[%c0, %c0_0] : memref<16x128xf32, #tpu.memory_space<vmem>>, vector<16x128xf32>
    %c0_1 = arith.constant 0 : index
    %c0_2 = arith.constant 0 : index
    %1 = vector.load %arg2[%c0_1, %c0_2] : memref<16x128xf32, #tpu.memory_space<vmem>>, vector<16x128xf32>
    tpu.vector_store %arg2[%c0_1, %c0_2], %0 {strides = array<i32>} : memref<16x128xf32, #tpu.memory_space<vmem>>, vector<16x128xf32>,
    return
  }
  func.func @transform_0(%arg0: i32) -> (i32, i32) {
    %c0_i32 = arith.constant 0 : i32
    %c0_i32_0 = arith.constant 0 : i32
    return %arg0, %c0_i32 : i32, i32
  }
  func.func @transform_1(%arg0: i32) -> (i32, i32) {
    %c0_i32 = arith.constant 0 : i32
    %c0_i32_0 = arith.constant 0 : i32
    return %arg0, %c0_i32 : i32, i32
  }
}

</mosaic_0001>

<bundles_post_ra>
// kernel: tpu_custom_call.1
= control target key start
LH: loop header
LB: loop body
LE: loop exit
PB: predicated region body
PF: predicated region fallthrough
CT: control target
= control target key end

     0   :  { %6 = vsyncpa [#allocation3], 0  ;;  %s134_s0 = inlined_call_operand.hbm [shape: f32[16,128], index: 0, kind: input, shape index: {}]   ;;  %s135_s1 = inlined_call_operand.hbm [shape: f32[16,128], index: 1, kind: output, shape index: {}]  }
   0x1   :  { %7 = vsyncpa [#allocation4], 0  ;;  %s96_s6 = smov [#allocation2]   ;;  %s48_s10 = scalar_lea.hbm %s134_s0, 256 }
   0x2   :  { %s13_s7 = sshll.u32 %s96_s6, 4  ;;  %p49_p0 = scmp.ne.s32.totalorder %s134_s0, %s48_s10  ;;  %s14_s7 = int_to_ptr.vmem [resolvable:$true] %s13_s7 }
   0x3   :  { %p52_p1 = scmp.lt.u32.totalorder %s48_s10, %s134_s0 }
   0x5   :  { %p54_p2 = pnand %p52_p1, %p49_p0 }
   0x7   :  { %57 = shalt.err (!%p54_p2)
}
   0x8   :  { %s58_s15 = scalar_lea.vmem %s14_s7, 256  ;;  %p63_p4 = scmp.lt.s32.totalorder %s14_s7, %s14_s7 }
   0x9   :  { %p59_p3 = scmp.ne.s32.totalorder %s14_s7, %s58_s15  ;;  %p64_p5 = scmp.lt.s32.totalorder %s58_s15, %s58_s15 }
   0xb   :  { %p65_p6 = por %p64_p5, %p63_p4 }
   0xd   :  { %p66_p7 = pnand %p65_p6, %p59_p3 }
   0xf   :  { %69 = shalt.err (!%p66_p7)
}
  0x10   :  { %s97_s16 = smov 128   ;;  %s98_s17 = smov 8  }
  0x11   :  { %19 = dma.hbm_to_vmem [thread:$0]  %s134_s0, 256, %s14_s7, [#allocation3], %s97_s16, %s97_s16, %s98_s17  }
  0x12   :  { %92 = dma.done.wait [#allocation3], 256  }
  0x13   :  { %93 = vsyncadd [#allocation3], 4294967040  ;;  %s99_s20 = smov [#allocation5]   ;;  %v23_v0 = vld [vmem:[#allocation2] sm:$0xff]  ;;  %v24_v1 = vld [vmem:[#allocation2 + $0x8] sm:$0xff] }
  0x14   :  { %s32_s21 = sshll.u32 %s99_s20, 4  ;;  %25 = vst [vmem:[#allocation5] sm:$0xff] %v23_v0  ;;  %26 = vst [vmem:[#allocation5 + $0x8] sm:$0xff] %v24_v1  ;;  %s33_s21 = int_to_ptr.vmem [resolvable:$true] %s32_s21 }
  0x15   :  { %s70_s22 = scalar_lea.vmem %s33_s21, 256  ;;  %p75_p9 = scmp.lt.s32.totalorder %s33_s21, %s33_s21 }
  0x16   :  { %p71_p8 = scmp.ne.s32.totalorder %s33_s21, %s70_s22  ;;  %p76_p10 = scmp.lt.s32.totalorder %s70_s22, %s70_s22 }
  0x18   :  { %p77_p11 = por %p76_p10, %p75_p9 }
  0x1a   :  { %p78_p12 = pnand %p77_p11, %p71_p8 }
  0x1c   :  { %81 = shalt.err (!%p78_p12)
}
  0x1d   :  { %s82_s0 = scalar_lea.hbm %s135_s1, 256 }
  0x1e   :  { %p83_p13 = scmp.ne.s32.totalorder %s135_s1, %s82_s0  ;;  %p86_p0 = scmp.lt.u32.totalorder %s82_s0, %s135_s1 }
  0x20   :  { %p88_p1 = pnand %p86_p0, %p83_p13 }
  0x22   :  { %91 = shalt.err (!%p88_p1)
}
  0x23   :  { %38 = dma.vmem_to_hbm [thread:$0]  %s33_s21, 256, %s135_s1, [#allocation4], %s97_s16, %s97_s16, %s98_s17  }
  0x24   :  { %94 = dma.done.wait [#allocation4], 256  }
  0x25   :  { %95 = vsyncadd [#allocation4], 4294967040 }
  0x26   :  { %42 = vsyncpa [#allocation3], 1 }
  0x27   :  { %43 = vsyncpa [#allocation4], 1 }

</bundles_post_ra>
